<compile_context>
chip_gen: v7x
topology: tpu7x:2x2x1
jax: 0.10.0
libtpu: 0.0.40
codegen_flags: <defaults>
</compile_context>

<pallas_src>
import functools

import jax
import jax.numpy as jnp
from jax.experimental import pallas as pl
from jax.experimental.pallas import tpu as pltpu

EPS = 1e-5  # torch.nn.LayerNorm default


def _round_up(n, m):
    return ((n + m - 1) // m) * m


def _sublayer_connection_kernel(x_ref, gamma_ref, beta_ref, w_ref, b_ref, o_ref,
                                *, mxu_dtype):
    # x_ref:      (TR, D)  row tile of the flattened input
    # gamma/beta: (1, D)   LayerNorm affine params
    # w_ref:      (D, D)   sublayer Linear weight, torch layout (out, in)
    # b_ref:      (1, D)   sublayer Linear bias
    x = x_ref[...].astype(jnp.float32)
    gamma = gamma_ref[...].astype(jnp.float32)
    beta = beta_ref[...].astype(jnp.float32)
    bias = b_ref[...].astype(jnp.float32)

    # --- LayerNorm over the last (lane) axis; biased variance like torch ---
    mean = jnp.mean(x, axis=-1, keepdims=True)
    centered = x - mean
    var = jnp.mean(centered * centered, axis=-1, keepdims=True)
    ln = centered * jax.lax.rsqrt(var + EPS)
    ln = ln * gamma + beta

    # --- sublayer: Linear(size, size) on the MXU.  Contract ln's feature dim
    #     against the weight's `in` dim (no transposed copy of W anywhere). ---
    y = jax.lax.dot_general(
        ln.astype(mxu_dtype), w_ref[...].astype(mxu_dtype),
        dimension_numbers=(((1,), (1,)), ((), ())),
        preferred_element_type=jnp.float32,
    ) + bias

    # --- dropout (eval mode => identity) + residual ---
    o_ref[...] = (x + y).astype(o_ref.dtype)


def _pick_block_rows(R, D, x_itemsize, w_itemsize, vmem_budget=24 << 20):
    """Largest row tile whose double-buffered x/out blocks + resident W fit the budget."""
    avail = vmem_budget - D * D * w_itemsize - 3 * D * 4
    # 2 (double-buffer) * 2 (x block + out block) * TR * D * itemsize
    tr = avail // max(1, 4 * D * x_itemsize)
    tr = max(8, min(int(tr), 512))       # diminishing returns past ~512 rows
    tr = max(8, (tr // 8) * 8)           # sublane multiple
    tr = min(tr, _round_up(R, 8))        # never bigger than the (padded) problem
    return tr


def sublayer_connection(x, gamma, beta, w, b):
    """x: (B, S, D). gamma/beta: (D,). w: (D, D) torch-style (out, in). b: (D,)."""
    B, S, D = x.shape
    R = B * S
    x2 = x.reshape(R, D)

    x_itemsize = jnp.dtype(x.dtype).itemsize
    w_itemsize = jnp.dtype(w.dtype).itemsize
    TR = _pick_block_rows(R, D, x_itemsize, w_itemsize)

    # Ragged tail: pad rows up to a multiple of TR (padded rows are sliced off;
    # zero rows stay finite through LayerNorm since var+eps > 0).
    R_pad = _round_up(R, TR)
    if R_pad != R:
        x2 = jnp.pad(x2, ((0, R_pad - R), (0, 0)))

    gamma2 = gamma.reshape(1, D)
    beta2 = beta.reshape(1, D)
    b2 = b.reshape(1, D)

    # bf16 MXU operands only when the model already runs in bf16.
    mxu_dtype = jnp.bfloat16 if x.dtype == jnp.bfloat16 else jnp.float32
    kernel = functools.partial(_sublayer_connection_kernel, mxu_dtype=mxu_dtype)

    grid = (pl.cdiv(R_pad, TR),)

    # Explicit VMEM limit: double-buffered x/out tiles + resident params + headroom.
    blk_bytes = 2 * 2 * TR * D * x_itemsize
    param_bytes = D * D * w_itemsize + 3 * D * 4
    vmem_limit = int(min(max(2 * (blk_bytes + param_bytes), 16 << 20), 64 << 20))

    out = pl.pallas_call(
        kernel,
        out_shape=jax.ShapeDtypeStruct((R_pad, D), x.dtype),
        grid_spec=pltpu.PrefetchScalarGridSpec(
            num_scalar_prefetch=0,
            grid=grid,
            in_specs=[
                pl.BlockSpec((TR, D), lambda i: (i, 0)),   # x row tile (pipelined)
                pl.BlockSpec((1, D), lambda i: (0, 0)),    # gamma (VMEM-resident)
                pl.BlockSpec((1, D), lambda i: (0, 0)),    # beta
                pl.BlockSpec((D, D), lambda i: (0, 0)),    # W (VMEM-resident)
                pl.BlockSpec((1, D), lambda i: (0, 0)),    # bias
            ],
            out_specs=pl.BlockSpec((TR, D), lambda i: (i, 0)),
        ),
        compiler_params=pltpu.CompilerParams(
            dimension_semantics=("parallel",),   # rows are independent -> megacore
            vmem_limit_bytes=vmem_limit,
        ),
    )(x2, gamma2, beta2, w, b2)

    return out[:R].reshape(B, S, D)


def _reference(x, gamma, beta, w, b):
    xf = x.astype(jnp.float32)
    mean = jnp.mean(xf, axis=-1, keepdims=True)
    var = jnp.mean((xf - mean) ** 2, axis=-1, keepdims=True)
    ln = (xf - mean) / jnp.sqrt(var + EPS) * gamma + beta
    y = jnp.einsum("bsd,od->bso", ln, w) + b
    return (xf + y).astype(x.dtype)


if __name__ == "__main__":
    # size=128 keeps the feature dim lane-dense (full 128-lane vregs, unmasked stores).
    batch, seq, size = 2, 8, 128
    key = jax.random.PRNGKey(0)
    kx, kw, kb, kg, kbeta = jax.random.split(key, 5)

    x = jax.random.normal(kx, (batch, seq, size), dtype=jnp.float32)

    # Deterministic parameter init (synthetic; shapes from the module's __init__
    # plus a Linear(size, size) standing in for `sublayer`).
    gamma = jnp.ones((size,), jnp.float32) + 0.01 * jax.random.normal(kg, (size,))
    beta = 0.01 * jax.random.normal(kbeta, (size,))
    w = jax.random.normal(kw, (size, size), dtype=jnp.float32) / jnp.sqrt(size)
    b = 0.01 * jax.random.normal(kb, (size,), dtype=jnp.float32)

    out = sublayer_connection(x, gamma, beta, w, b)
    out = jax.block_until_ready(out)

    ref = _reference(x, gamma, beta, w, b)
    assert out.shape == (batch, seq, size)
    assert jnp.allclose(out, ref, atol=1e-3, rtol=1e-3), "mismatch vs reference"

    print("KERNEL_OK")
</pallas_src>

<mosaic_0001>
module attributes {stable_mosaic.version = 11 : i64} {
  func.func @_sublayer_connection_kernel(%arg0: i32, %arg1: memref<16x128xf32, #tpu.memory_space<vmem>>, %arg2: memref<1x128xf32, #tpu.memory_space<vmem>>, %arg3: memref<1x128xf32, #tpu.memory_space<vmem>>, %arg4: memref<128x128xf32, #tpu.memory_space<vmem>>, %arg5: memref<1x128xf32, #tpu.memory_space<vmem>>, %arg6: memref<16x128xf32, #tpu.memory_space<vmem>>) attributes {dimension_semantics = [#tpu.dimension_semantics<parallel>], iteration_bounds = array<i64: 1>, scalar_prefetch = 0 : i64, scratch_operands = 0 : i64, tpu.core_type = #tpu.core_type<tc>, window_params = [{transform_indices = @transform_0, window_bounds = array<i64: 16, 128>}, {pipeline_mode = #tpu.pipeline_mode<synchronous>, transform_indices = @transform_1, window_bounds = array<i64: 1, 128>}, {pipeline_mode = #tpu.pipeline_mode<synchronous>, transform_indices = @transform_2, window_bounds = array<i64: 1, 128>}, {pipeline_mode = #tpu.pipeline_mode<synchronous>, transform_indices = @transform_3, window_bounds = array<i64: 128, 128>}, {pipeline_mode = #tpu.pipeline_mode<synchronous>, transform_indices = @transform_4, window_bounds = array<i64: 1, 128>}, {transform_indices = @transform_5, window_bounds = array<i64: 16, 128>}]} {
    %c0 = arith.constant 0 : index
    %c0_0 = arith.constant 0 : index
    %0 = vector.load %arg1[%c0, %c0_0] : memref<16x128xf32, #tpu.memory_space<vmem>>, vector<16x128xf32>
    %c0_1 = arith.constant 0 : index
    %c0_2 = arith.constant 0 : index
    %1 = vector.load %arg2[%c0_1, %c0_2] : memref<1x128xf32, #tpu.memory_space<vmem>>, vector<1x128xf32>
    %c0_3 = arith.constant 0 : index
    %c0_4 = arith.constant 0 : index
    %2 = vector.load %arg3[%c0_3, %c0_4] : memref<1x128xf32, #tpu.memory_space<vmem>>, vector<1x128xf32>
    %c0_5 = arith.constant 0 : index
    %c0_6 = arith.constant 0 : index
    %3 = vector.load %arg5[%c0_5, %c0_6] : memref<1x128xf32, #tpu.memory_space<vmem>>, vector<1x128xf32>
    %cst = arith.constant dense<0.000000e+00> : vector<16xf32>
    %4 = vector.multi_reduction <add>, %0, %cst [1] : vector<16x128xf32> to vector<16xf32>
    %5 = vector.shape_cast %4 : vector<16xf32> to vector<16x1xf32>
    %cst_7 = arith.constant 1.280000e+02 : f32
    %6 = vector.broadcast %cst_7 : f32 to vector<16x1xf32>
    %7 = arith.divf %5, %6 : vector<16x1xf32>
    %8 = vector.broadcast %7 : vector<16x1xf32> to vector<16x128xf32>
    %9 = arith.subf %0, %8 : vector<16x128xf32>
    %10 = arith.mulf %9, %9 : vector<16x128xf32>
    %cst_8 = arith.constant dense<0.000000e+00> : vector<16xf32>
    %11 = vector.multi_reduction <add>, %10, %cst_8 [1] : vector<16x128xf32> to vector<16xf32>
    %12 = vector.shape_cast %11 : vector<16xf32> to vector<16x1xf32>
    %cst_9 = arith.constant 1.280000e+02 : f32
    %13 = vector.broadcast %cst_9 : f32 to vector<16x1xf32>
    %14 = arith.divf %12, %13 : vector<16x1xf32>
    %cst_10 = arith.constant 9.99999974E-6 : f32
    %15 = vector.broadcast %cst_10 : f32 to vector<16x1xf32>
    %16 = arith.addf %14, %15 : vector<16x1xf32>
    %17 = math.rsqrt %16 : vector<16x1xf32>
    %18 = vector.broadcast %17 : vector<16x1xf32> to vector<16x128xf32>
    %19 = arith.mulf %9, %18 : vector<16x128xf32>
    %20 = vector.broadcast %1 : vector<1x128xf32> to vector<16x128xf32>
    %21 = arith.mulf %19, %20 : vector<16x128xf32>
    %22 = vector.broadcast %2 : vector<1x128xf32> to vector<16x128xf32>
    %23 = arith.addf %21, %22 : vector<16x128xf32>
    %c0_11 = arith.constant 0 : index
    %c0_12 = arith.constant 0 : index
    %24 = vector.load %arg4[%c0_11, %c0_12] : memref<128x128xf32, #tpu.memory_space<vmem>>, vector<128x128xf32>
    %cst_13 = arith.constant dense<0.000000e+00> : vector<16x128xf32>
    %25 = tpu.matmul %23, %24, %cst_13 {dimension_numbers = #tpu.dot_dimension_numbers<[1], [1], [0], [0], [0, 0, 1, 0], [], []>} : vector<16x128xf32>, vector<128x128xf32>, vector<16x128xf32> -> vector<16x128xf32>
    %26 = vector.broadcast %3 : vector<1x128xf32> to vector<16x128xf32>
    %27 = arith.addf %25, %26 : vector<16x128xf32>
    %28 = arith.addf %0, %27 : vector<16x128xf32>
    %c0_14 = arith.constant 0 : index
    %c0_15 = arith.constant 0 : index
    %29 = vector.load %arg6[%c0_14, %c0_15] : memref<16x128xf32, #tpu.memory_space<vmem>>, vector<16x128xf32>
    tpu.vector_store %arg6[%c0_14, %c0_15], %28 {strides = array<i32>} : memref<16x128xf32, #tpu.memory_space<vmem>>, vector<16x128xf32>,
    return
  }
  func.func @transform_0(%arg0: i32) -> (i32, i32) {
    %c0_i32 = arith.constant 0 : i32
    %c0_i32_0 = arith.constant 0 : i32
    return %arg0, %c0_i32 : i32, i32
  }
  func.func @transform_1(%arg0: i32) -> (i32, i32) {
    %c0_i32 = arith.constant 0 : i32
    %c0_i32_0 = arith.constant 0 : i32
    %c0_i32_1 = arith.constant 0 : i32
    return %c0_i32, %c0_i32_0 : i32, i32
  }
  func.func @transform_2(%arg0: i32) -> (i32, i32) {
    %c0_i32 = arith.constant 0 : i32
    %c0_i32_0 = arith.constant 0 : i32
    %c0_i32_1 = arith.constant 0 : i32
    return %c0_i32, %c0_i32_0 : i32, i32
  }
  func.func @transform_3(%arg0: i32) -> (i32, i32) {
    %c0_i32 = arith.constant 0 : i32
    %c0_i32_0 = arith.constant 0 : i32
    %c0_i32_1 = arith.constant 0 : i32
    return %c0_i32, %c0_i32_0 : i32, i32
  }
  func.func @transform_4(%arg0: i32) -> (i32, i32) {
    %c0_i32 = arith.constant 0 : i32
    %c0_i32_0 = arith.constant 0 : i32
    %c0_i32_1 = arith.constant 0 : i32
    return %c0_i32, %c0_i32_0 : i32, i32
  }
  func.func @transform_5(%arg0: i32) -> (i32, i32) {
    %c0_i32 = arith.constant 0 : i32
    %c0_i32_0 = arith.constant 0 : i32
    return %arg0, %c0_i32 : i32, i32
  }
}

</mosaic_0001>

<bundles_post_ra>
// kernel: tpu_custom_call.1
= control target key start
LH: loop header
LB: loop body
LE: loop exit
PB: predicated region body
PF: predicated region fallthrough
CT: control target
= control target key end

     0   :  { %10 = vsyncpa [#allocation3], 0  ;;  %s480_s0 = inlined_call_operand.hbm [shape: f32[16,128], index: 0, kind: input, shape index: {}]   ;;  %s481_s1 = inlined_call_operand.vmem [shape: f32[1,128], index: 1, kind: input, shape index: {}]   ;;  %s482_s2 = inlined_call_operand.vmem [shape: f32[1,128], index: 2, kind: input, shape index: {}]   ;;  %s483_s3 = inlined_call_operand.hbm [shape: f32[128,128], index: 3, kind: input, shape index: {}]   ;;  %s484_s4 = inlined_call_operand.vmem [shape: f32[1,128], index: 4, kind: input, shape index: {}]   ;;  %s485_s5 = inlined_call_operand.hbm [shape: f32[16,128], index: 5, kind: output, shape index: {}]  }
   0x1   :  { %11 = vsyncpa [#allocation6], 0 }
   0x2   :  { %12 = vsyncpa [#allocation4], 0  ;;  %s381_s18 = smov [#allocation2]   ;;  %s309_s22 = scalar_lea.hbm %s480_s0, 256 }
   0x3   :  { %s18_s19 = sshll.u32 %s381_s18, 4  ;;  %p310_p0 = scmp.ne.s32.totalorder %s480_s0, %s309_s22  ;;  %s19_s19 = int_to_ptr.vmem [resolvable:$true] %s18_s19 }
   0x4   :  { %p313_p1 = scmp.lt.u32.totalorder %s309_s22, %s480_s0 }
   0x6   :  { %p315_p2 = pnand %p313_p1, %p310_p0 }
   0x8   :  { %318 = shalt.err (!%p315_p2)
}
   0x9   :  { %s319_s27 = scalar_lea.vmem %s19_s19, 256  ;;  %p324_p4 = scmp.lt.s32.totalorder %s19_s19, %s19_s19 }
   0xa   :  { %p320_p3 = scmp.ne.s32.totalorder %s19_s19, %s319_s27  ;;  %p325_p5 = scmp.lt.s32.totalorder %s319_s27, %s319_s27 }
   0xc   :  { %p326_p6 = por %p325_p5, %p324_p4 }
   0xe   :  { %p327_p7 = pnand %p326_p6, %p320_p3 }
  0x10   :  { %330 = shalt.err (!%p327_p7)
}
  0x11   :  { %s382_s28 = smov 128   ;;  %s383_s29 = smov 8  }
  0x12   :  { %24 = dma.hbm_to_vmem [thread:$0]  %s480_s0, 256, %s19_s19, [#allocation3], %s382_s28, %s382_s28, %s383_s29  }
  0x13   :  { %s384_s7 = smov [#allocation5]   ;;  %s331_s11 = scalar_lea.hbm %s483_s3, 2048 }
  0x14   :  { %s34_s8 = sshll.u32 %s384_s7, 4  ;;  %p332_p8 = scmp.ne.s32.totalorder %s483_s3, %s331_s11  ;;  %s35_s8 = int_to_ptr.vmem [resolvable:$true] %s34_s8 }
  0x15   :  { %p335_p9 = scmp.lt.u32.totalorder %s331_s11, %s483_s3 }
  0x17   :  { %p337_p10 = pnand %p335_p9, %p332_p8 }
  0x19   :  { %340 = shalt.err (!%p337_p10)
}
  0x1a   :  { %s341_s16 = scalar_lea.vmem %s35_s8, 2048  ;;  %p346_p12 = scmp.lt.s32.totalorder %s35_s8, %s35_s8 }
  0x1b   :  { %p342_p11 = scmp.ne.s32.totalorder %s35_s8, %s341_s16  ;;  %p347_p13 = scmp.lt.s32.totalorder %s341_s16, %s341_s16 }
  0x1d   :  { %p348_p0 = por %p347_p13, %p346_p12 }
  0x1f   :  { %p349_p1 = pnand %p348_p0, %p342_p11 }
  0x21   :  { %352 = shalt.err (!%p349_p1)
}
  0x22   :  { %40 = dma.hbm_to_vmem [thread:$0]  %s483_s3, 2048, %s35_s8, [#allocation6], %s382_s28, %s382_s28, %s383_s29  }
  0x23   :  { %375 = dma.done.wait [#allocation3], 256  }
  0x24   :  { %376 = vsyncadd [#allocation3], 4294967040 }
  0x25   :  { %377 = dma.done.wait [#allocation6], 2048  }
  0x26   :  { %378 = vsyncadd [#allocation6], 4294965248  ;;  %v446_v0 = vld [vmem:[#allocation2] sm:$0xff]  ;;  %v449_v1 = vld [vmem:[#allocation2 + $0x8] sm:$0xff] }
  0x27   :  { %54 = vadd.xlane.f32.xlu0 %v446_v0  ;;  %v93_v2 = vld [vmem:[#allocation5] sm:$0xff]  ;;  %v94_v3 = vld [vmem:[#allocation5 + $0x8] sm:$0xff]  ;;  %v95_v4 = vld [vmem:[#allocation5 + $0x10] sm:$0xff] }
  0x28   :  { %v268_v5 = vpack.c.bf16 %v94_v3, %v93_v2  ;;  %v96_v6 = vld [vmem:[#allocation5 + $0x18] sm:$0xff]  ;;  %v97_v8 = vld [vmem:[#allocation5 + $0x20] sm:$0xff]  ;;  %v98_v9 = vld [vmem:[#allocation5 + $0x28] sm:$0xff] }
  0x29   :  { %v272_v7 = vpack.c.bf16 %v96_v6, %v95_v4  ;;  %v276_v10 = vpack.c.bf16 %v98_v9, %v97_v8  ;;  %v99_v11 = vld [vmem:[#allocation5 + $0x30] sm:$0xff]  ;;  %v100_v12 = vld [vmem:[#allocation5 + $0x38] sm:$0xff]  ;;  %v101_v14 = vld [vmem:[#allocation5 + $0x40] sm:$0xff] }
  0x2a   :  { %269 = vmatprep.subr.bf16.mxu0 %v268_v5  ;;  %v280_v13 = vpack.c.bf16 %v100_v12, %v99_v11  ;;  %v102_v15 = vld [vmem:[#allocation5 + $0x48] sm:$0xff]  ;;  %v103_v25 = vld [vmem:[#allocation5 + $0x50] sm:$0xff]  ;;  %v104_v26 = vld [vmem:[#allocation5 + $0x58] sm:$0xff] }
  0x2b   :  { %56 = vadd.xlane.f32.xlu0 %v449_v1  ;;  %271 = vmatpush3.bf16.xpose.msra.mxu0 %v268_v5  ;;  %v284_v16 = vpack.c.bf16 %v102_v15, %v101_v14  ;;  %v288_v27 = vpack.c.bf16 %v104_v26, %v103_v25  ;;  %v105_v28 = vld [vmem:[#allocation5 + $0x60] sm:$0xff]  ;;  %v106_v29 = vld [vmem:[#allocation5 + $0x68] sm:$0xff]  ;;  %v107_v31 = vld [vmem:[#allocation5 + $0x70] sm:$0xff] }
  0x2c   :  { %273 = vmatprep.subr.bf16.mxu0 %v272_v7  ;;  %v292_v30 = vpack.c.bf16 %v106_v29, %v105_v28  ;;  %v108_v32 = vld [vmem:[#allocation5 + $0x78] sm:$0xff]  ;;  %v212_v41 = vld [vmem:[%s481_s1] ss:$0 sm:$0xff]  ;;  %s385_s1 = smov [#allocation7]  }
  0x2d   :  { %v296_v33 = vpack.c.bf16 %v108_v32, %v107_v31  ;;  %v213_v43 = vld [vmem:[%s482_s2] ss:$0 sm:$0xff]  ;;  %s199_s23 = sshll.u32 %s385_s1, 4  ;;  %s200_s23 = int_to_ptr.vmem [resolvable:$true] %s199_s23 }
  0x2e   :  { %v214_v50 = vld [vmem:[%s484_s4] ss:$0 sm:$0xff]  ;;  %s353_s2 = scalar_lea.vmem %s200_s23, 256  ;;  %p358_p3 = scmp.lt.s32.totalorder %s200_s23, %s200_s23 }
  0x2f   :  { %p354_p2 = scmp.ne.s32.totalorder %s200_s23, %s353_s2  ;;  %p359_p4 = scmp.lt.s32.totalorder %s353_s2, %s353_s2 }
  0x31   :  { %p360_p5 = por %p359_p4, %p358_p3 }
  0x33   :  { %275 = vmatpush3.bf16.xpose.msra.mxu0 %v272_v7  ;;  %p361_p6 = pnand %p360_p5, %p354_p2 }
  0x34   :  { %277 = vmatprep.subr.bf16.mxu0 %v276_v10 }
  0x3b   :  { %279 = vmatpush3.bf16.xpose.msra.mxu0 %v276_v10 }
  0x3c   :  { %281 = vmatprep.subr.bf16.mxu0 %v280_v13 }
  0x43   :  { %283 = vmatpush3.bf16.xpose.msra.mxu0 %v280_v13 }
  0x44   :  { %285 = vmatprep.subr.bf16.mxu0 %v284_v16 }
  0x4b   :  { %287 = vmatpush3.bf16.xpose.msra.mxu0 %v284_v16 }
  0x4c   :  { %289 = vmatprep.subr.bf16.mxu0 %v288_v27 }
  0x53   :  { %291 = vmatpush3.bf16.xpose.msra.mxu0 %v288_v27 }
  0x54   :  { %293 = vmatprep.subr.bf16.mxu0 %v292_v30 }
  0x5b   :  { %295 = vmatpush3.bf16.xpose.msra.mxu0 %v292_v30 }
  0x5c   :  { %297 = vmatprep.subr.bf16.mxu0 %v296_v33 }
  0x63   :  { %299 = vmatpush3.bf16.xpose.msra.mxu0 %v296_v33 }
  0xb4   :  { %v55_v17 = vpop.xlane.xlu0 %54 }
  0xb5   :  { %v59_v18 = vmul.f32 0.0078125, %v55_v17 }
  0xb7   :  { %v61_v19 = vsub.f32 %v446_v0, %v59_v18 }
  0xb8   :  { %v57_v20 = vpop.xlane.xlu0 %56 }
  0xb9   :  { %v60_v21 = vmul.f32 0.0078125, %v57_v20  ;;  %v63_v22 = vmul.f32 %v61_v19, %v61_v19 }
  0xbb   :  { %v62_v23 = vsub.f32 %v449_v1, %v60_v21  ;;  %65 = vadd.xlane.f32.xlu1 %v63_v22 }
  0xbd   :  { %v64_v24 = vmul.f32 %v62_v23, %v62_v23 }
  0xbf   :  { %67 = vadd.xlane.f32.xlu1 %v64_v24 }
 0x148   :  { %v66_v34 = vpop.xlane.xlu1 %65 }
 0x149   :  { %v69_v35 = vmul.f32 0.0078125, %v66_v34 }
 0x14b   :  { %v71_v36 = vadd.f32 1e-05, %v69_v35 }
 0x14c   :  { %v68_v37 = vpop.xlane.xlu1 %67 }
 0x14d   :  { %305 = vrsqrt.f32 %v71_v36  ;;  %v70_v38 = vmul.f32 0.0078125, %v68_v37 }
 0x14f   :  { %v72_v39 = vadd.f32 1e-05, %v70_v38 }
 0x151   :  { %307 = vrsqrt.f32 %v72_v39 }
 0x157   :  { %v306_v40 = vpop.eup %305 }
 0x158   :  { %v75_v42 = vmul.f32 %v306_v40, %v61_v19 }
 0x15a   :  { %v83_v44 = vmul.f32 %v212_v41, %v75_v42 }
 0x15b   :  { %v308_v45 = vpop.eup %307 }
 0x15c   :  { %v76_v46 = vmul.f32 %v308_v45, %v62_v23  ;;  %v91_v47 = vadd.f32 %v213_v43, %v83_v44 }
 0x15e   :  { %v84_v48 = vmul.f32 %v212_v41, %v76_v46  ;;  %265 = vmatprep.mubr.f32.mxu0 %v91_v47 }
 0x160   :  { %v92_v49 = vadd.f32 %v213_v43, %v84_v48 }
 0x162   :  { %266 = vmatmul.mubr.f32.vlgmr.msra.gmra.mrb[0].mxu0 %v92_v49 }
 0x235   :  { %v267_v51 = vpop.f32.mrb[0].mxu0 }
 0x236   :  { %v187_v52 = vadd.f32 %v267_v51, %v214_v50  ;;  %v181_v53 = vpop.f32.mrb[1].mxu0 }
 0x237   :  { %v182_v54 = vadd.f32 %v214_v50, %v181_v53 }
 0x238   :  { %v191_v55 = vadd.f32 %v187_v52, %v449_v1 }
 0x239   :  { %v190_v56 = vadd.f32 %v182_v54, %v446_v0 }
 0x23a   :  { %193 = vst [vmem:[#allocation7 + $0x8] sm:$0xff] %v191_v55 }
 0x23b   :  { %192 = vst [vmem:[#allocation7] sm:$0xff] %v190_v56 }
 0x23c   :  { %364 = shalt.err (!%p361_p6)
}
 0x23d   :  { %s365_s25 = scalar_lea.hbm %s485_s5, 256 }
 0x23e   :  { %p366_p7 = scmp.ne.s32.totalorder %s485_s5, %s365_s25  ;;  %p369_p8 = scmp.lt.u32.totalorder %s365_s25, %s485_s5 }
 0x240   :  { %p371_p9 = pnand %p369_p8, %p366_p7 }
 0x242   :  { %374 = shalt.err (!%p371_p9)
}
 0x243   :  { %205 = dma.vmem_to_hbm [thread:$0]  %s200_s23, 256, %s485_s5, [#allocation4], %s382_s28, %s382_s28, %s383_s29  }
 0x244   :  { %379 = dma.done.wait [#allocation4], 256  }
 0x245   :  { %380 = vsyncadd [#allocation4], 4294967040 }
 0x246   :  { %209 = vsyncpa [#allocation3], 1 }
 0x247   :  { %210 = vsyncpa [#allocation6], 1 }
 0x248   :  { %211 = vsyncpa [#allocation4], 1 }

</bundles_post_ra>
